<compile_context>
chip_gen: v5e
topology: v5e:2x2
jax: 0.10.0
libtpu: 0.0.40
codegen_flags: <defaults>
</compile_context>

<pallas_src>
import math
import functools

import jax
import jax.numpy as jnp
from jax.experimental import pallas as pl
from jax.experimental.pallas import tpu as pltpu


# ---------------------------------------------------------------------------
# helpers
# ---------------------------------------------------------------------------

def _round_up(x, m):
    return (x + m - 1) // m * m


def _pick_tile(dim, align, max_tile):
    """Pick a tile size: multiple of `align`, <= max_tile, minimal padding."""
    aligned = _round_up(dim, align)
    if aligned <= max_tile:
        return aligned
    for t in range(max_tile, align - 1, -align):
        if aligned % t == 0:
            return t
    return align


# ---------------------------------------------------------------------------
# dense path kernels:  tanh(x @ W^T + b)
# ---------------------------------------------------------------------------

def _dense_tanh_kernel_single_k(x_ref, w_ref, b_ref, o_ref):
    # Single K tile: keep everything in vregs, no VMEM accumulator roundtrip.
    y = jnp.dot(x_ref[...], w_ref[...], preferred_element_type=jnp.float32)
    y = y + b_ref[...].astype(jnp.float32)
    o_ref[...] = jnp.tanh(y).astype(o_ref.dtype)


def _dense_tanh_kernel_multi_k(x_ref, w_ref, b_ref, o_ref, acc_ref):
    k = pl.program_id(2)

    @pl.when(k == 0)
    def _():
        # Initialize the accumulator with the bias (saves an epilogue add).
        acc_ref[...] = jnp.broadcast_to(
            b_ref[...].astype(jnp.float32), acc_ref.shape)

    acc_ref[...] += jnp.dot(x_ref[...], w_ref[...],
                            preferred_element_type=jnp.float32)

    @pl.when(k == pl.num_programs(2) - 1)
    def _():
        o_ref[...] = jnp.tanh(acc_ref[...]).astype(o_ref.dtype)


@functools.partial(
    jax.jit,
    static_argnames=("tm", "tn", "tk", "use_bf16_operands", "vmem_limit_bytes"),
)
def dense_tanh(x, weight_t, bias, *, tm=None, tn=None, tk=None,
               use_bf16_operands=False, vmem_limit_bytes=64 << 20):
    """tanh(x @ weight_t + bias).  x: (M, H); weight_t: (H, N); bias: (N,)."""
    M, H = x.shape
    H2, N = weight_t.shape
    assert H == H2 and bias.shape == (N,)
    out_dtype = x.dtype

    # VMEM-budgeted, lane-dense tile defaults (128-aligned N/K, 8-aligned M).
    tm = tm or _pick_tile(M, 8, 512)
    tn = tn or _pick_tile(N, 128, 512)
    tk = tk or _pick_tile(H, 128, 512)

    Mp, Np, Hp = _round_up(M, tm), _round_up(N, tn), _round_up(H, tk)

    in_bytes = 2 if use_bf16_operands else jnp.dtype(x.dtype).itemsize
    out_bytes = jnp.dtype(out_dtype).itemsize
    footprint = (2 * (tm * tk + tk * tn + tn) * in_bytes
                 + tm * tn * 4 + 2 * tm * tn * out_bytes)
    assert footprint <= vmem_limit_bytes, (
        f"tile footprint {footprint} B exceeds VMEM budget {vmem_limit_bytes} B")

    # Zero-pad to tile multiples (zeros along K contribute nothing to the dot;
    # padded rows/cols of the output are sliced off below).
    xp = x if (Mp, Hp) == (M, H) else jnp.pad(x, ((0, Mp - M), (0, Hp - H)))
    wp = (weight_t if (Hp, Np) == (H, N)
          else jnp.pad(weight_t, ((0, Hp - H), (0, Np - N))))
    bp = bias if Np == N else jnp.pad(bias, (0, Np - N))
    b2d = bp.reshape(1, Np)

    if use_bf16_operands:
        xp = xp.astype(jnp.bfloat16)
        wp = wp.astype(jnp.bfloat16)

    nk = Hp // tk
    compiler_params = dict(vmem_limit_bytes=vmem_limit_bytes)

    if nk == 1:
        out_p = pl.pallas_call(
            _dense_tanh_kernel_single_k,
            out_shape=jax.ShapeDtypeStruct((Mp, Np), out_dtype),
            grid_spec=pltpu.PrefetchScalarGridSpec(
                num_scalar_prefetch=0,
                grid=(Mp // tm, Np // tn),
                in_specs=[
                    pl.BlockSpec((tm, Hp), lambda i, j: (i, 0)),
                    pl.BlockSpec((Hp, tn), lambda i, j: (0, j)),
                    pl.BlockSpec((1, tn), lambda i, j: (0, j)),
                ],
                out_specs=pl.BlockSpec((tm, tn), lambda i, j: (i, j)),
            ),
            compiler_params=pltpu.CompilerParams(
                dimension_semantics=("parallel", "parallel"),
                **compiler_params),
        )(xp, wp, b2d)
    else:
        out_p = pl.pallas_call(
            _dense_tanh_kernel_multi_k,
            out_shape=jax.ShapeDtypeStruct((Mp, Np), out_dtype),
            grid_spec=pltpu.PrefetchScalarGridSpec(
                num_scalar_prefetch=0,
                grid=(Mp // tm, Np // tn, nk),
                in_specs=[
                    pl.BlockSpec((tm, tk), lambda i, j, k: (i, k)),
                    pl.BlockSpec((tk, tn), lambda i, j, k: (k, j)),
                    pl.BlockSpec((1, tn), lambda i, j, k: (0, j)),
                ],
                out_specs=pl.BlockSpec((tm, tn), lambda i, j, k: (i, j)),
                scratch_shapes=[pltpu.VMEM((tm, tn), jnp.float32)],
            ),
            compiler_params=pltpu.CompilerParams(
                dimension_semantics=("parallel", "parallel", "arbitrary"),
                **compiler_params),
        )(xp, wp, b2d)

    return out_p[:M, :N] if (Mp, Np) != (M, N) else out_p


# ---------------------------------------------------------------------------
# non-dense path kernel: layer-sum + seq-pool + tanh
# ---------------------------------------------------------------------------

def _pool_tanh_kernel(h_ref, o_ref, *, pooling_mode, inv_scale):
    x = h_ref[...].astype(jnp.float32)        # (L, tb, S, th)
    x = jnp.sum(x, axis=0)                    # (tb, S, th)
    if pooling_mode == "avg":
        pooled = jnp.sum(x, axis=1) * inv_scale
    else:  # "cls"
        pooled = x[:, 0, :] * inv_scale
    o_ref[...] = jnp.tanh(pooled).astype(o_ref.dtype)


def _pool_tanh(stacked, *, pooling_mode, tb=None, th=None,
               vmem_limit_bytes=64 << 20):
    """stacked: (L, B, S, H) -> tanh(pool(mean_over_L(stacked))): (B, H)."""
    L, B, S, H = stacked.shape
    out_dtype = stacked.dtype

    tb = tb or _pick_tile(B, 8, 256)
    th = th or _pick_tile(H, 128, 512)
    Bp, Hp = _round_up(B, tb), _round_up(H, th)

    in_bytes = jnp.dtype(stacked.dtype).itemsize
    footprint = 2 * L * tb * S * th * in_bytes + 2 * tb * th * in_bytes
    assert footprint <= vmem_limit_bytes, (
        f"pool tile footprint {footprint} B exceeds VMEM budget")
    # TODO(synk): for very long sequences, add a seq grid axis with an
    # accumulator instead of holding the full (L, tb, S, th) block in VMEM.

    hp = stacked
    if (Bp, Hp) != (B, H):
        hp = jnp.pad(stacked, ((0, 0), (0, Bp - B), (0, 0), (0, Hp - H)))

    inv_scale = 1.0 / (L * S) if pooling_mode == "avg" else 1.0 / L
    kernel = functools.partial(_pool_tanh_kernel,
                               pooling_mode=pooling_mode,
                               inv_scale=float(inv_scale))

    out_p = pl.pallas_call(
        kernel,
        out_shape=jax.ShapeDtypeStruct((Bp, Hp), out_dtype),
        grid_spec=pltpu.PrefetchScalarGridSpec(
            num_scalar_prefetch=0,
            grid=(Bp // tb, Hp // th),
            in_specs=[pl.BlockSpec((L, tb, S, th), lambda i, j: (0, i, 0, j))],
            out_specs=pl.BlockSpec((tb, th), lambda i, j: (i, j)),
        ),
        compiler_params=pltpu.CompilerParams(
            dimension_semantics=("parallel", "parallel"),
            vmem_limit_bytes=vmem_limit_bytes),
    )(hp)

    return out_p[:B, :H] if (Bp, Hp) != (B, H) else out_p


# ---------------------------------------------------------------------------
# CosteffPooler forward (both config paths)
# ---------------------------------------------------------------------------

def costeff_pooler_dense(all_hidden_states, weight_t, bias, **kw):
    """config.pooler_dense == True path."""
    hidden_states = all_hidden_states[-1]        # (B, S, H)
    first_token = hidden_states[:, 0, :]         # (B, H)
    return dense_tanh(first_token, weight_t, bias, **kw)


def costeff_pooler_nondense(all_hidden_states, *, hidden_mode, pooling_mode,
                            last_n_hidden, **kw):
    """config.pooler_dense == False path."""
    if not isinstance(last_n_hidden, int) or last_n_hidden <= 0:
        raise ValueError(
            "Invalid last_n_hidden %s. Expecting a positive int." % last_n_hidden)
    hs = list(all_hidden_states)
    if last_n_hidden == 1:
        stacked = hs[-1][None]                                 # (1, B, S, H)
    elif hidden_mode == "avg":
        stacked = jnp.stack(hs[-last_n_hidden:], axis=0)       # (L, B, S, H)
    elif hidden_mode == "concat":
        n = min(last_n_hidden, len(hs))
        stacked = jnp.concatenate(hs[-n:], axis=-1)[None]      # (1, B, S, n*H)
    else:
        raise ValueError(
            "Invalid hidden_mode %s. Options: `avg`, `concat`." % hidden_mode)
    if pooling_mode not in ("avg", "cls"):
        raise ValueError(
            "Invalid pooling_mode %s. Options: `avg`, `cls`." % pooling_mode)
    return _pool_tanh(stacked, pooling_mode=pooling_mode, **kw)


# ---------------------------------------------------------------------------
# references
# ---------------------------------------------------------------------------

def reference_dense(all_hidden_states, weight_t, bias):
    cls = all_hidden_states[-1][:, 0, :]
    return jnp.tanh(cls @ weight_t + bias)


def reference_nondense(all_hidden_states, hidden_mode, pooling_mode, last_n):
    hs = list(all_hidden_states)
    if last_n == 1:
        h = hs[-1]
    elif hidden_mode == "avg":
        sel = hs[-last_n:]
        h = sum(sel) / len(sel)
    else:  # concat
        n = min(last_n, len(hs))
        h = jnp.concatenate(hs[-n:], axis=-1)
    t = h.mean(axis=1) if pooling_mode == "avg" else h[:, 0, :]
    return jnp.tanh(t)


# ---------------------------------------------------------------------------
# main
# ---------------------------------------------------------------------------

if __name__ == "__main__":
    batch, seq, hidden, n_layers = 2, 8, 32, 4

    key = jax.random.PRNGKey(0)
    keys = jax.random.split(key, n_layers + 2)
    all_hidden_states = tuple(
        jax.random.normal(keys[i], (batch, seq, hidden), dtype=jnp.float32)
        for i in range(n_layers))

    # nn.Linear(hidden, hidden): weight is (out, in); stored pre-transposed
    # here as (in, out) = W^T.
    w_t = jax.random.normal(keys[n_layers], (hidden, hidden),
                            dtype=jnp.float32) * (1.0 / math.sqrt(hidden))
    b = jax.random.normal(keys[n_layers + 1], (hidden,),
                          dtype=jnp.float32) * 0.02

    # pooler_dense=True path (fused matmul + bias + tanh kernel)
    out_dense = jax.block_until_ready(
        costeff_pooler_dense(all_hidden_states, w_t, b))
    ref_dense = reference_dense(all_hidden_states, w_t, b)
    assert out_dense.shape == (batch, hidden)
    assert jnp.allclose(out_dense, ref_dense, atol=1e-5, rtol=1e-5), \
        "dense pooler mismatch vs reference"

    # pooler_dense=False paths (fused layer-avg / pooling / tanh kernel)
    for hidden_mode, pooling_mode, last_n in [
        ("avg", "avg", 2), ("avg", "cls", 2),
        ("concat", "cls", 2), ("avg", "avg", 1),
    ]:
        out_nd = jax.block_until_ready(costeff_pooler_nondense(
            all_hidden_states, hidden_mode=hidden_mode,
            pooling_mode=pooling_mode, last_n_hidden=last_n))
        ref_nd = reference_nondense(all_hidden_states, hidden_mode,
                                    pooling_mode, last_n)
        assert out_nd.shape == ref_nd.shape
        assert jnp.allclose(out_nd, ref_nd, atol=1e-5, rtol=1e-5), \
            f"non-dense pooler mismatch ({hidden_mode},{pooling_mode},{last_n})"

    print("KERNEL_OK")
</pallas_src>

<mosaic_0001>
module attributes {stable_mosaic.version = 11 : i64} {
  func.func @_dense_tanh_kernel_single_k(%arg0: i32, %arg1: i32, %arg2: memref<8x128xf32, #tpu.memory_space<vmem>>, %arg3: memref<128x128xf32, #tpu.memory_space<vmem>>, %arg4: memref<1x128xf32, #tpu.memory_space<vmem>>, %arg5: memref<8x128xf32, #tpu.memory_space<vmem>>) attributes {dimension_semantics = [#tpu.dimension_semantics<parallel>, #tpu.dimension_semantics<parallel>], iteration_bounds = array<i64: 1, 1>, scalar_prefetch = 0 : i64, scratch_operands = 0 : i64, tpu.core_type = #tpu.core_type<tc>, window_params = [{transform_indices = @transform_0, window_bounds = array<i64: 8, 128>}, {transform_indices = @transform_1, window_bounds = array<i64: 128, 128>}, {transform_indices = @transform_2, window_bounds = array<i64: 1, 128>}, {transform_indices = @transform_3, window_bounds = array<i64: 8, 128>}]} {
    %c0 = arith.constant 0 : index
    %c0_0 = arith.constant 0 : index
    %0 = vector.load %arg2[%c0, %c0_0] : memref<8x128xf32, #tpu.memory_space<vmem>>, vector<8x128xf32>
    %c0_1 = arith.constant 0 : index
    %c0_2 = arith.constant 0 : index
    %1 = vector.load %arg3[%c0_1, %c0_2] : memref<128x128xf32, #tpu.memory_space<vmem>>, vector<128x128xf32>
    %cst = arith.constant dense<0.000000e+00> : vector<8x128xf32>
    %2 = tpu.matmul %0, %1, %cst {dimension_numbers = #tpu.dot_dimension_numbers<[1], [0], [0], [1], [0, 0, 1, 1], [], []>} : vector<8x128xf32>, vector<128x128xf32>, vector<8x128xf32> -> vector<8x128xf32>
    %c0_3 = arith.constant 0 : index
    %c0_4 = arith.constant 0 : index
    %3 = vector.load %arg4[%c0_3, %c0_4] : memref<1x128xf32, #tpu.memory_space<vmem>>, vector<1x128xf32>
    %4 = vector.broadcast %3 : vector<1x128xf32> to vector<8x128xf32>
    %5 = arith.addf %2, %4 : vector<8x128xf32>
    %6 = math.tanh %5 : vector<8x128xf32>
    %c0_5 = arith.constant 0 : index
    %c0_6 = arith.constant 0 : index
    %7 = vector.load %arg5[%c0_5, %c0_6] : memref<8x128xf32, #tpu.memory_space<vmem>>, vector<8x128xf32>
    tpu.vector_store %arg5[%c0_5, %c0_6], %6 {strides = array<i32>} : memref<8x128xf32, #tpu.memory_space<vmem>>, vector<8x128xf32>,
    return
  }
  func.func @transform_0(%arg0: i32, %arg1: i32) -> (i32, i32) {
    %c0_i32 = arith.constant 0 : i32
    %c0_i32_0 = arith.constant 0 : i32
    return %arg0, %c0_i32 : i32, i32
  }
  func.func @transform_1(%arg0: i32, %arg1: i32) -> (i32, i32) {
    %c0_i32 = arith.constant 0 : i32
    %c0_i32_0 = arith.constant 0 : i32
    return %c0_i32, %arg1 : i32, i32
  }
  func.func @transform_2(%arg0: i32, %arg1: i32) -> (i32, i32) {
    %c0_i32 = arith.constant 0 : i32
    %c0_i32_0 = arith.constant 0 : i32
    return %c0_i32, %arg1 : i32, i32
  }
  func.func @transform_3(%arg0: i32, %arg1: i32) -> (i32, i32) {
    %c0_i32 = arith.constant 0 : i32
    return %arg0, %arg1 : i32, i32
  }
}

</mosaic_0001>

<bundles_post_ra>
// kernel: dense_tanh.1
= control target key start
LH: loop header
LB: loop body
LE: loop exit
PB: predicated region body
PF: predicated region fallthrough
CT: control target
= control target key end

     0   :  { %s141_s1 = inlined_call_operand.vmem [shape: f32[128,128], index: 1, kind: input, shape index: {}]   ;;  %s142_s2 = inlined_call_operand.vmem [shape: f32[1,128], index: 2, kind: input, shape index: {}]   ;;  %s143_s0 = inlined_call_operand.vmem [shape: f32[8,128], index: 0, kind: input, shape index: {}]   ;;  %s144_s3 = inlined_call_operand.vmem [shape: f32[8,128], index: 3, kind: output, shape index: {}]  }
   0x1   :  { %v30_v0 = vld [vmem:[%s141_s1 + $0x78] sm:$0xff]  ;;  %v29_v1 = vld [vmem:[%s141_s1 + $0x70] sm:$0xff]  ;;  %v28_v2 = vld [vmem:[%s141_s1 + $0x68] sm:$0xff] }
   0x2   :  { %35 = vmatpush.msra.mxu0 %v30_v0  ;;  %v27_v3 = vld [vmem:[%s141_s1 + $0x60] sm:$0xff]  ;;  %v26_v4 = vld [vmem:[%s141_s1 + $0x58] sm:$0xff]  ;;  %v25_v5 = vld [vmem:[%s141_s1 + $0x50] sm:$0xff] }
   0x3   :  { %v24_v6 = vld [vmem:[%s141_s1 + $0x48] sm:$0xff]  ;;  %v23_v7 = vld [vmem:[%s141_s1 + $0x40] sm:$0xff]  ;;  %v22_v8 = vld [vmem:[%s141_s1 + $0x38] sm:$0xff] }
   0x4   :  { %36 = vmatpush.msra.mxu0 %v29_v1  ;;  %v21_v9 = vld [vmem:[%s141_s1 + $0x30] sm:$0xff]  ;;  %v20_v10 = vld [vmem:[%s141_s1 + $0x28] sm:$0xff]  ;;  %v19_v11 = vld [vmem:[%s141_s1 + $0x20] sm:$0xff] }
   0x5   :  { %v18_v12 = vld [vmem:[%s141_s1 + $0x18] sm:$0xff]  ;;  %v17_v13 = vld [vmem:[%s141_s1 + $0x10] sm:$0xff]  ;;  %v16_v14 = vld [vmem:[%s141_s1 + $0x8] sm:$0xff] }
   0x6   :  { %37 = vmatpush.msra.mxu0 %v28_v2  ;;  %v15_v15 = vld [vmem:[%s141_s1] sm:$0xff] }
   0x7   :  { %v14_v16 = vld [vmem:[%s143_s0] sm:$0xff] }
   0x8   :  { %38 = vmatpush.msra.mxu0 %v27_v3  ;;  %v61_v17 = vld [vmem:[%s142_s2] ss:$0 sm:$0xff] }
   0xa   :  { %39 = vmatpush.msra.mxu0 %v26_v4 }
   0xc   :  { %40 = vmatpush.msra.mxu0 %v25_v5 }
   0xe   :  { %41 = vmatpush.msra.mxu0 %v24_v6 }
  0x10   :  { %42 = vmatpush.msra.mxu0 %v23_v7 }
  0x12   :  { %43 = vmatpush.msra.mxu0 %v22_v8 }
  0x14   :  { %44 = vmatpush.msra.mxu0 %v21_v9 }
  0x16   :  { %45 = vmatpush.msra.mxu0 %v20_v10 }
  0x18   :  { %46 = vmatpush.msra.mxu0 %v19_v11 }
  0x1a   :  { %47 = vmatpush.msra.mxu0 %v18_v12 }
  0x1c   :  { %48 = vmatpush.msra.mxu0 %v17_v13 }
  0x1e   :  { %49 = vmatpush.msra.mxu0 %v16_v14 }
  0x20   :  { %50 = vmatpush.msra.mxu0 %v15_v15 }
  0x21   :  { %51 = vmatmul.f32.vlgmr.msra.gmra.mxu0 %v14_v16 }
  0x9e   :  { %v52_v18 = vpop.f32.mrf.mxu0 }
  0x9f   :  { %v53_v19 = vadd.f32 %v61_v17, %v52_v18 }
  0xa1   :  { %62 = vtanh.f32 %v53_v19 }
  0xa7   :  { %v63_v20 = vpop.eup %62 }
  0xa8   :  { %56 = vst [vmem:[%s144_s3] sm:$0xff] %v63_v20 }

</bundles_post_ra>
